<compile_context>
chip_gen: v7x
topology: tpu7x:2x2x1
jax: 0.10.0
libtpu: 0.0.40
codegen_flags: <defaults>
</compile_context>

<pallas_src>
import math

import jax
import jax.numpy as jnp
from jax import lax
from jax.experimental import pallas as pl
from jax.experimental.pallas import tpu as pltpu

EPS = 1e-12


def _round_up(x, m):
    return ((x + m - 1) // m) * m


def _sublane_multiple(dtype):
    # Rows per fully-packed vreg sublane group: 8 (f32), 16 (bf16), 32 (i8/fp8).
    itemsize = jnp.dtype(dtype).itemsize
    return max(8, 32 // max(1, itemsize))


def _pick_block_rows(n_rows, d_padded, dtype,
                     target_bytes=2 << 20, min_grid=8):
    """Byte-budgeted, dtype-aware row-strip size.

    ~2 MiB of x per block => double-buffered in + out stays well under the
    scoped-VMEM default on every TPU generation while hitting the large-tile
    regime of the HBM roofline.  Also ensures at least `min_grid` grid steps
    when N is large enough so both v7x TensorCores get pipelined work.
    """
    itemsize = jnp.dtype(dtype).itemsize
    sub = _sublane_multiple(dtype)
    row_bytes = d_padded * itemsize

    # Byte budget, rounded down to the sublane packing multiple.
    br = max(sub, (target_bytes // max(1, row_bytes)) // sub * sub)

    # Never larger than the (sublane-rounded) whole problem.
    br = min(br, _round_up(n_rows, sub))

    # Keep >= min_grid steps for megacore sharding / pipeline overlap when
    # there are enough rows to make that meaningful.
    if n_rows > min_grid * sub:
        br = min(br, _round_up(pl.cdiv(n_rows, min_grid), sub))

    return max(br, sub)


def _make_layernorm_kernel(d_actual, d_padded):
    need_mask = d_actual != d_padded

    def layernorm_kernel(x_ref, gamma_ref, beta_ref, o_ref):
        # x_ref block: (block_rows, Dp); gamma/beta: (1, Dp); o_ref: (block_rows, Dp)
        x = x_ref[...].astype(jnp.float32)
        g = gamma_ref[...].astype(jnp.float32)
        b = beta_ref[...].astype(jnp.float32)

        if need_mask:
            # Pad lanes excluded from the statistics; output pad lanes are
            # sliced away in the wrapper, so their values are irrelevant.
            lane = lax.broadcasted_iota(jnp.int32, x.shape, dimension=x.ndim - 1)
            valid = lane < d_actual
            xm = jnp.where(valid, x, 0.0)
            mean = jnp.sum(xm, axis=-1, keepdims=True) * (1.0 / d_actual)
            xc = jnp.where(valid, x - mean, 0.0)
            var = jnp.sum(xc * xc, axis=-1, keepdims=True) * (1.0 / d_actual)
        else:
            mean = jnp.mean(x, axis=-1, keepdims=True)   # XLU cross-lane reduce
            xc = x - mean
            var = jnp.mean(xc * xc, axis=-1, keepdims=True)

        inv_std = lax.rsqrt(var + EPS)                    # EUP; avoids sqrt+div on VPU
        y = xc * inv_std * g + b                          # (1, Dp) broadcasts over rows
        o_ref[...] = y.astype(o_ref.dtype)

    return layernorm_kernel


def layer_norm(x, gamma, beta, *, block_rows=None):
    """LayerNorm over the last axis of `x`. gamma/beta: shape (D,)."""
    orig_shape = x.shape
    D = orig_shape[-1]
    N = max(1, math.prod(orig_shape[:-1])) if len(orig_shape) > 1 else 1
    Dp = _round_up(D, 128)  # lane-dense feature dim (unmasked vst)

    x2 = x.reshape(N, D)
    g2 = gamma.reshape(1, D)
    b2 = beta.reshape(1, D)
    if Dp != D:
        x2 = jnp.pad(x2, ((0, 0), (0, Dp - D)))
        g2 = jnp.pad(g2, ((0, 0), (0, Dp - D)), constant_values=1)
        b2 = jnp.pad(b2, ((0, 0), (0, Dp - D)))

    if block_rows is None:
        block_rows = _pick_block_rows(N, Dp, x.dtype)
    grid = (pl.cdiv(N, block_rows),)   # ragged last strip is masked by Pallas

    kernel = _make_layernorm_kernel(D, Dp)

    out = pl.pallas_call(
        kernel,
        out_shape=jax.ShapeDtypeStruct((N, Dp), x.dtype),
        grid_spec=pltpu.PrefetchScalarGridSpec(
            num_scalar_prefetch=0,
            grid=grid,
            in_specs=[
                pl.BlockSpec((block_rows, Dp), lambda i: (i, 0)),
                pl.BlockSpec((1, Dp), lambda i: (0, 0)),
                pl.BlockSpec((1, Dp), lambda i: (0, 0)),
            ],
            out_specs=pl.BlockSpec((block_rows, Dp), lambda i: (i, 0)),
        ),
        compiler_params=pltpu.CompilerParams(
            dimension_semantics=("parallel",)),
    )(x2, g2, b2)

    if Dp != D:
        out = out[:, :D]
    return out.reshape(orig_shape)


def layer_norm_reference(x, gamma, beta, eps=EPS):
    """Plain-JAX reference matching the PyTorch module's forward."""
    mean = jnp.mean(x, axis=-1, keepdims=True)
    xc = x - mean
    var = jnp.mean(xc * xc, axis=-1, keepdims=True)
    std = jnp.sqrt(var + eps)
    return xc / std * gamma + beta


if __name__ == "__main__":
    # Small shapes consistent with the module: batch=2, seq=8, input_dim=128.
    B, S, D = 2, 8, 128

    key = jax.random.PRNGKey(0)
    kx, kg, kb = jax.random.split(key, 3)

    x = jax.random.normal(kx, (B, S, D), dtype=jnp.float32)
    # Module init is gamma=ones, beta=zeros; perturb so the affine terms matter.
    gamma = 1.0 + 0.1 * jax.random.normal(kg, (D,), dtype=jnp.float32)
    beta = 0.1 * jax.random.normal(kb, (D,), dtype=jnp.float32)

    out = jax.block_until_ready(layer_norm(x, gamma, beta))
    ref = layer_norm_reference(x, gamma, beta)
    assert out.shape == x.shape
    assert jnp.allclose(out, ref, atol=1e-5, rtol=1e-5), "mismatch (3D, D=128)"

    # Multi-block grid with a ragged last row strip (N = 4*250 = 1000 rows).
    x2 = jax.random.normal(jax.random.PRNGKey(1), (4, 250, D), dtype=jnp.float32)
    out2 = jax.block_until_ready(layer_norm(x2, gamma, beta))
    ref2 = layer_norm_reference(x2, gamma, beta)
    assert jnp.allclose(out2, ref2, atol=1e-5, rtol=1e-5), "mismatch (ragged rows)"

    # Feature dim not a multiple of 128 -> wrapper pads lanes, kernel masks stats.
    D3 = 96
    g3 = 1.0 + 0.1 * jax.random.normal(kg, (D3,), dtype=jnp.float32)
    b3 = 0.1 * jax.random.normal(kb, (D3,), dtype=jnp.float32)
    x3 = jax.random.normal(jax.random.PRNGKey(2), (3, 40, D3), dtype=jnp.float32)
    out3 = jax.block_until_ready(layer_norm(x3, g3, b3))
    ref3 = layer_norm_reference(x3, g3, b3)
    assert jnp.allclose(out3, ref3, atol=1e-5, rtol=1e-5), "mismatch (padded D)"

    print("KERNEL_OK")
</pallas_src>

<mosaic_0001>
module attributes {stable_mosaic.version = 11 : i64} {
  func.func @layernorm_kernel(%arg0: i32, %arg1: memref<16x128xf32, #tpu.memory_space<vmem>>, %arg2: memref<1x128xf32, #tpu.memory_space<vmem>>, %arg3: memref<1x128xf32, #tpu.memory_space<vmem>>, %arg4: memref<16x128xf32, #tpu.memory_space<vmem>>) attributes {dimension_semantics = [#tpu.dimension_semantics<parallel>], iteration_bounds = array<i64: 1>, scalar_prefetch = 0 : i64, scratch_operands = 0 : i64, tpu.core_type = #tpu.core_type<tc>, window_params = [{transform_indices = @transform_0, window_bounds = array<i64: 16, 128>}, {pipeline_mode = #tpu.pipeline_mode<synchronous>, transform_indices = @transform_1, window_bounds = array<i64: 1, 128>}, {pipeline_mode = #tpu.pipeline_mode<synchronous>, transform_indices = @transform_2, window_bounds = array<i64: 1, 128>}, {transform_indices = @transform_3, window_bounds = array<i64: 16, 128>}]} {
    %c0 = arith.constant 0 : index
    %c0_0 = arith.constant 0 : index
    %0 = vector.load %arg1[%c0, %c0_0] : memref<16x128xf32, #tpu.memory_space<vmem>>, vector<16x128xf32>
    %c0_1 = arith.constant 0 : index
    %c0_2 = arith.constant 0 : index
    %1 = vector.load %arg2[%c0_1, %c0_2] : memref<1x128xf32, #tpu.memory_space<vmem>>, vector<1x128xf32>
    %c0_3 = arith.constant 0 : index
    %c0_4 = arith.constant 0 : index
    %2 = vector.load %arg3[%c0_3, %c0_4] : memref<1x128xf32, #tpu.memory_space<vmem>>, vector<1x128xf32>
    %cst = arith.constant dense<0.000000e+00> : vector<16xf32>
    %3 = vector.multi_reduction <add>, %0, %cst [1] : vector<16x128xf32> to vector<16xf32>
    %4 = vector.shape_cast %3 : vector<16xf32> to vector<16x1xf32>
    %cst_5 = arith.constant 1.280000e+02 : f32
    %5 = vector.broadcast %cst_5 : f32 to vector<16x1xf32>
    %6 = arith.divf %4, %5 : vector<16x1xf32>
    %7 = vector.broadcast %6 : vector<16x1xf32> to vector<16x128xf32>
    %8 = arith.subf %0, %7 : vector<16x128xf32>
    %9 = arith.mulf %8, %8 : vector<16x128xf32>
    %cst_6 = arith.constant dense<0.000000e+00> : vector<16xf32>
    %10 = vector.multi_reduction <add>, %9, %cst_6 [1] : vector<16x128xf32> to vector<16xf32>
    %11 = vector.shape_cast %10 : vector<16xf32> to vector<16x1xf32>
    %cst_7 = arith.constant 1.280000e+02 : f32
    %12 = vector.broadcast %cst_7 : f32 to vector<16x1xf32>
    %13 = arith.divf %11, %12 : vector<16x1xf32>
    %cst_8 = arith.constant 9.99999996E-13 : f32
    %14 = vector.broadcast %cst_8 : f32 to vector<16x1xf32>
    %15 = arith.addf %13, %14 : vector<16x1xf32>
    %16 = math.rsqrt %15 : vector<16x1xf32>
    %17 = vector.broadcast %16 : vector<16x1xf32> to vector<16x128xf32>
    %18 = arith.mulf %8, %17 : vector<16x128xf32>
    %19 = vector.broadcast %1 : vector<1x128xf32> to vector<16x128xf32>
    %20 = arith.mulf %18, %19 : vector<16x128xf32>
    %21 = vector.broadcast %2 : vector<1x128xf32> to vector<16x128xf32>
    %22 = arith.addf %20, %21 : vector<16x128xf32>
    %c0_9 = arith.constant 0 : index
    %c0_10 = arith.constant 0 : index
    %23 = vector.load %arg4[%c0_9, %c0_10] : memref<16x128xf32, #tpu.memory_space<vmem>>, vector<16x128xf32>
    tpu.vector_store %arg4[%c0_9, %c0_10], %22 {strides = array<i32>} : memref<16x128xf32, #tpu.memory_space<vmem>>, vector<16x128xf32>,
    return
  }
  func.func @transform_0(%arg0: i32) -> (i32, i32) {
    %c0_i32 = arith.constant 0 : i32
    %c0_i32_0 = arith.constant 0 : i32
    return %arg0, %c0_i32 : i32, i32
  }
  func.func @transform_1(%arg0: i32) -> (i32, i32) {
    %c0_i32 = arith.constant 0 : i32
    %c0_i32_0 = arith.constant 0 : i32
    %c0_i32_1 = arith.constant 0 : i32
    return %c0_i32, %c0_i32_0 : i32, i32
  }
  func.func @transform_2(%arg0: i32) -> (i32, i32) {
    %c0_i32 = arith.constant 0 : i32
    %c0_i32_0 = arith.constant 0 : i32
    %c0_i32_1 = arith.constant 0 : i32
    return %c0_i32, %c0_i32_0 : i32, i32
  }
  func.func @transform_3(%arg0: i32) -> (i32, i32) {
    %c0_i32 = arith.constant 0 : i32
    %c0_i32_0 = arith.constant 0 : i32
    return %arg0, %c0_i32 : i32, i32
  }
}

</mosaic_0001>

<bundles_post_ra>
// kernel: tpu_custom_call.1
= control target key start
LH: loop header
LB: loop body
LE: loop exit
PB: predicated region body
PF: predicated region fallthrough
CT: control target
= control target key end

     0   :  { %8 = vsyncpa [#allocation3], 0  ;;  %s209_s0 = inlined_call_operand.hbm [shape: f32[16,128], index: 0, kind: input, shape index: {}]   ;;  %s210_s1 = inlined_call_operand.vmem [shape: f32[1,128], index: 1, kind: input, shape index: {}]   ;;  %s211_s2 = inlined_call_operand.vmem [shape: f32[1,128], index: 2, kind: input, shape index: {}]   ;;  %s212_s3 = inlined_call_operand.hbm [shape: f32[16,128], index: 3, kind: output, shape index: {}]  }
   0x1   :  { %9 = vsyncpa [#allocation4], 0  ;;  %s149_s12 = smov [#allocation2]   ;;  %s101_s16 = scalar_lea.hbm %s209_s0, 256 }
   0x2   :  { %s15_s13 = sshll.u32 %s149_s12, 4  ;;  %p102_p0 = scmp.ne.s32.totalorder %s209_s0, %s101_s16  ;;  %s16_s13 = int_to_ptr.vmem [resolvable:$true] %s15_s13 }
   0x3   :  { %p105_p1 = scmp.lt.u32.totalorder %s101_s16, %s209_s0 }
   0x5   :  { %p107_p2 = pnand %p105_p1, %p102_p0 }
   0x7   :  { %110 = shalt.err (!%p107_p2)
}
   0x8   :  { %s111_s21 = scalar_lea.vmem %s16_s13, 256  ;;  %p116_p4 = scmp.lt.s32.totalorder %s16_s13, %s16_s13 }
   0x9   :  { %p112_p3 = scmp.ne.s32.totalorder %s16_s13, %s111_s21  ;;  %p117_p5 = scmp.lt.s32.totalorder %s111_s21, %s111_s21 }
   0xb   :  { %p118_p6 = por %p117_p5, %p116_p4 }
   0xd   :  { %p119_p7 = pnand %p118_p6, %p112_p3 }
   0xf   :  { %122 = shalt.err (!%p119_p7)
}
  0x10   :  { %s150_s22 = smov 128   ;;  %s151_s23 = smov 8  }
  0x11   :  { %21 = dma.hbm_to_vmem [thread:$0]  %s209_s0, 256, %s16_s13, [#allocation3], %s150_s22, %s150_s22, %s151_s23  }
  0x12   :  { %145 = dma.done.wait [#allocation3], 256  }
  0x13   :  { %146 = vsyncadd [#allocation3], 4294967040  ;;  %v29_v0 = vld [vmem:[#allocation2] sm:$0xff]  ;;  %v30_v1 = vld [vmem:[#allocation2 + $0x8] sm:$0xff]  ;;  %s152_s29 = smov [#allocation5]  }
  0x14   :  { %33 = vadd.xlane.f32.xlu0 %v29_v0  ;;  %v91_v17 = vld [vmem:[%s210_s1] ss:$0 sm:$0xff]  ;;  %s79_s30 = sshll.u32 %s152_s29, 4  ;;  %s80_s30 = int_to_ptr.vmem [resolvable:$true] %s79_s30 }
  0x15   :  { %v92_v19 = vld [vmem:[%s211_s2] ss:$0 sm:$0xff]  ;;  %s123_s4 = scalar_lea.vmem %s80_s30, 256  ;;  %p128_p9 = scmp.lt.s32.totalorder %s80_s30, %s80_s30 }
  0x16   :  { %p124_p8 = scmp.ne.s32.totalorder %s80_s30, %s123_s4  ;;  %p129_p10 = scmp.lt.s32.totalorder %s123_s4, %s123_s4 }
  0x18   :  { %35 = vadd.xlane.f32.xlu0 %v30_v1  ;;  %p130_p11 = por %p129_p10, %p128_p9 }
  0x1a   :  { %p131_p12 = pnand %p130_p11, %p124_p8 }
  0xa1   :  { %v34_v2 = vpop.xlane.xlu0 %33 }
  0xa2   :  { %v38_v3 = vmul.f32 0.0078125, %v34_v2 }
  0xa4   :  { %v40_v4 = vsub.f32 %v29_v0, %v38_v3 }
  0xa5   :  { %v36_v5 = vpop.xlane.xlu0 %35 }
  0xa6   :  { %v39_v6 = vmul.f32 0.0078125, %v36_v5  ;;  %v42_v7 = vmul.f32 %v40_v4, %v40_v4 }
  0xa8   :  { %v41_v8 = vsub.f32 %v30_v1, %v39_v6  ;;  %44 = vadd.xlane.f32.xlu1 %v42_v7 }
  0xaa   :  { %v43_v9 = vmul.f32 %v41_v8, %v41_v8 }
  0xac   :  { %46 = vadd.xlane.f32.xlu1 %v43_v9 }
 0x135   :  { %v45_v10 = vpop.xlane.xlu1 %44 }
 0x136   :  { %v48_v11 = vmul.f32 0.0078125, %v45_v10 }
 0x138   :  { %v50_v12 = vadd.f32 1e-12, %v48_v11 }
 0x139   :  { %v47_v13 = vpop.xlane.xlu1 %46 }
 0x13a   :  { %97 = vrsqrt.f32 %v50_v12  ;;  %v49_v14 = vmul.f32 0.0078125, %v47_v13 }
 0x13c   :  { %v51_v15 = vadd.f32 1e-12, %v49_v14 }
 0x13e   :  { %99 = vrsqrt.f32 %v51_v15 }
 0x144   :  { %v98_v16 = vpop.eup %97 }
 0x145   :  { %v54_v18 = vmul.f32 %v98_v16, %v40_v4 }
 0x147   :  { %v62_v20 = vmul.f32 %v91_v17, %v54_v18 }
 0x148   :  { %v100_v21 = vpop.eup %99 }
 0x149   :  { %v55_v22 = vmul.f32 %v100_v21, %v41_v8  ;;  %v70_v23 = vadd.f32 %v92_v19, %v62_v20 }
 0x14b   :  { %v63_v24 = vmul.f32 %v91_v17, %v55_v22  ;;  %72 = vst [vmem:[#allocation5] sm:$0xff] %v70_v23 }
 0x14d   :  { %v71_v25 = vadd.f32 %v92_v19, %v63_v24 }
 0x14f   :  { %73 = vst [vmem:[#allocation5 + $0x8] sm:$0xff] %v71_v25 }
 0x150   :  { %134 = shalt.err (!%p131_p12)
}
 0x151   :  { %s135_s5 = scalar_lea.hbm %s212_s3, 256 }
 0x152   :  { %p136_p13 = scmp.ne.s32.totalorder %s212_s3, %s135_s5  ;;  %p139_p0 = scmp.lt.u32.totalorder %s135_s5, %s212_s3 }
 0x154   :  { %p141_p1 = pnand %p139_p0, %p136_p13 }
 0x156   :  { %144 = shalt.err (!%p141_p1)
}
 0x157   :  { %85 = dma.vmem_to_hbm [thread:$0]  %s80_s30, 256, %s212_s3, [#allocation4], %s150_s22, %s150_s22, %s151_s23  }
 0x158   :  { %147 = dma.done.wait [#allocation4], 256  }
 0x159   :  { %148 = vsyncadd [#allocation4], 4294967040 }
 0x15a   :  { %89 = vsyncpa [#allocation3], 1 }
 0x15b   :  { %90 = vsyncpa [#allocation4], 1 }

</bundles_post_ra>
